<compile_context>
chip_gen: v7x
topology: tpu7x:2x2x1
jax: 0.10.0
libtpu: 0.0.40
codegen_flags: <defaults>
</compile_context>

<pallas_src>
from functools import partial

import jax
import jax.numpy as jnp
from jax.experimental import pallas as pl
from jax.experimental.pallas import tpu as pltpu

_LANES = 128
_ROW_TILE = 2048  # 2048 x 128 x 4B = 1 MiB per f32 block


def _passthrough_kernel(in_ref, out_ref):
    # Pure identity copy of the current lane-dense tile.
    out_ref[...] = in_ref[...]


def _fused_identity(packed):
    """Single fused lane-dense identity copy of the packed parameter buffer."""
    rows, lanes = packed.shape
    row_tile = min(rows, _ROW_TILE)  # full array if small, 2048-row tiles if big
    grid = (pl.cdiv(rows, row_tile),)
    spec = pl.BlockSpec((row_tile, lanes), lambda i: (i, 0), memory_space=pltpu.VMEM)
    return pl.pallas_call(
        _passthrough_kernel,
        out_shape=jax.ShapeDtypeStruct(packed.shape, packed.dtype),
        grid=grid,
        in_specs=[spec],
        out_specs=spec,
        # Output aliases the input buffer -> no extra HBM writeback copy.
        input_output_aliases={0: 0},
        compiler_params=pltpu.CompilerParams(
            dimension_semantics=("parallel",)
        ),
    )(packed)


@partial(jax.jit, static_argnames=("use_linear_term",))
def classifier_forward(quadratic, bias, linear=None, *, use_linear_term=True):
    """Pallas equivalent of Classifier.forward().

    quadratic: (input_dim, 1) f32
    linear:    (input_dim, 1) f32 or None
    bias:      (1,) f32
    Returns (quadratic, linear, bias) or (quadratic, bias), identical to the
    PyTorch module.
    """
    input_dim = quadratic.shape[0]
    dtype = quadratic.dtype

    # --- pack all parameters into one lane-dense (rows, 128) buffer ---------
    parts = [quadratic.reshape(-1)]
    if use_linear_term:
        assert linear is not None
        parts.append(linear.reshape(-1))
    parts.append(bias.reshape(-1).astype(dtype))
    flat = jnp.concatenate(parts)
    total = flat.shape[0]

    rows = pl.cdiv(total, _LANES)
    padded = rows * _LANES
    packed = jnp.zeros((padded,), dtype=dtype).at[:total].set(flat)
    packed = packed.reshape(rows, _LANES)

    # --- single Pallas pass-through (forward() does no arithmetic) ----------
    packed_out = _fused_identity(packed)

    # --- unpack back to the module's parameter shapes -----------------------
    flat_out = packed_out.reshape(-1)
    q_out = flat_out[:input_dim].reshape(input_dim, 1)
    off = input_dim
    if use_linear_term:
        l_out = flat_out[off:off + input_dim].reshape(input_dim, 1)
        off += input_dim
    b_out = flat_out[off:off + 1].astype(bias.dtype)

    if use_linear_term:
        return q_out, l_out, b_out
    return q_out, b_out


if __name__ == "__main__":
    # Deterministic parameter init matching Classifier.__init__ shapes.
    input_dim = 32

    key = jax.random.PRNGKey(0)
    kq, kl, kb = jax.random.split(key, 3)
    quadratic = jax.random.normal(kq, (input_dim, 1), dtype=jnp.float32)
    linear = jax.random.normal(kl, (input_dim, 1), dtype=jnp.float32)
    bias = jax.random.normal(kb, (1,), dtype=jnp.float32)

    # use_linear_term=True branch
    q_out, l_out, b_out = jax.block_until_ready(
        classifier_forward(quadratic, bias, linear, use_linear_term=True)
    )
    assert q_out.shape == (input_dim, 1) and q_out.dtype == quadratic.dtype
    assert l_out.shape == (input_dim, 1) and l_out.dtype == linear.dtype
    assert b_out.shape == (1,) and b_out.dtype == bias.dtype
    assert jnp.array_equal(q_out, quadratic)
    assert jnp.array_equal(l_out, linear)
    assert jnp.array_equal(b_out, bias)

    # use_linear_term=False branch
    q2, b2 = jax.block_until_ready(
        classifier_forward(quadratic, bias, None, use_linear_term=False)
    )
    assert jnp.array_equal(q2, quadratic)
    assert jnp.array_equal(b2, bias)

    print("KERNEL_OK")
</pallas_src>

<mosaic_0001>
module attributes {stable_mosaic.version = 11 : i64} {
  func.func @_passthrough_kernel(%arg0: i32, %arg1: memref<1x128xf32, #tpu.memory_space<vmem>>, %arg2: memref<1x128xf32, #tpu.memory_space<vmem>>) attributes {dimension_semantics = [#tpu.dimension_semantics<parallel>], iteration_bounds = array<i64: 1>, scalar_prefetch = 0 : i64, scratch_operands = 0 : i64, tpu.core_type = #tpu.core_type<tc>, window_params = [{transform_indices = @transform_0, window_bounds = array<i64: 1, 128>}, {transform_indices = @transform_1, window_bounds = array<i64: 1, 128>}]} {
    %c0 = arith.constant 0 : index
    %c0_0 = arith.constant 0 : index
    %0 = vector.load %arg1[%c0, %c0_0] : memref<1x128xf32, #tpu.memory_space<vmem>>, vector<1x128xf32>
    %c0_1 = arith.constant 0 : index
    %c0_2 = arith.constant 0 : index
    %1 = vector.load %arg2[%c0_1, %c0_2] : memref<1x128xf32, #tpu.memory_space<vmem>>, vector<1x128xf32>
    tpu.vector_store %arg2[%c0_1, %c0_2], %0 {strides = array<i32>} : memref<1x128xf32, #tpu.memory_space<vmem>>, vector<1x128xf32>,
    return
  }
  func.func @transform_0(%arg0: i32) -> (i32, i32) {
    %c0_i32 = arith.constant 0 : i32
    %c0_i32_0 = arith.constant 0 : i32
    return %arg0, %c0_i32 : i32, i32
  }
  func.func @transform_1(%arg0: i32) -> (i32, i32) {
    %c0_i32 = arith.constant 0 : i32
    %c0_i32_0 = arith.constant 0 : i32
    return %arg0, %c0_i32 : i32, i32
  }
}

</mosaic_0001>

<bundles_post_ra>
// kernel: classifier_forward.1
= control target key start
LH: loop header
LB: loop body
LE: loop exit
PB: predicated region body
PF: predicated region fallthrough
CT: control target
= control target key end

     0   :  { %s30_s0 = inlined_call_operand.vmem [shape: f32[1,128], index: 0, kind: input, shape index: {}, may-alias: {0,1}]   ;;  %s31_s1 = inlined_call_operand.vmem [shape: f32[1,128], index: 1, kind: output, shape index: {}, may-alias: {0,1}]  }
   0x1   :  { %v8_v0 = vld [vmem:[%s30_s0] sm:$0x1] }
   0x2   :  { %9 = vst [vmem:[%s31_s1] sm:$0x1] %v8_v0 }

</bundles_post_ra>
